<compile_context>
chip_gen: v7x
topology: tpu7x:2x2x1
jax: 0.10.0
libtpu: 0.0.40
codegen_flags: <defaults>
</compile_context>

<pallas_src>
import functools

import jax
import jax.numpy as jnp
from jax.experimental import pallas as pl
from jax.experimental.pallas import tpu as pltpu

# ----- model constants (from puzzle/fosae.py) -----
LAYER_SIZE = 300
N = 9
BASE_SIZE = 1                          # BASE_SIZE is undefined in the snippet; pick 1
N_OBJ_FEATURE = (BASE_SIZE * 3) ** 2   # = 9
P = 9
U = 9

IN_F = U * P * 2                       # fc1 input width   = 162
OUT_F = N * N_OBJ_FEATURE              # fc2 output width  = 81
OUT_PAD = 128                          # pad to one full lane group (unmasked stores)
EPS = 1e-5


def _round_up(x, m):
    return (x + m - 1) // m * m


# =====================================================================
# Fused PredicateDecoder kernel.
#   grid = (Bp // TB,), one batch tile of TB rows per step ("parallel").
# =====================================================================
def _decoder_kernel(bn_ref, z_ref, w1_ref, b1_ref, w2_ref, b2_ref, o_ref):
    k = bn_ref[0, 0]                    # gamma / sqrt(running_var + eps)
    sh = bn_ref[0, 1]                   # beta - running_mean * k
    # fc1: (TB, 162) @ (162, 300) on the MXU, bf16 operands, f32 accumulate.
    h = jnp.dot(z_ref[...].astype(jnp.bfloat16), w1_ref[...],
                preferred_element_type=jnp.float32) + b1_ref[...]
    # eval-mode BatchNorm1d(1): a single scalar affine over every element (f32).
    h = h * k + sh
    # Dropout(0.4) is identity in eval mode.
    # fc2: (TB, 300) @ (300, 128-padded) on the MXU, f32 accumulate.
    y = jnp.dot(h.astype(jnp.bfloat16), w2_ref[...],
                preferred_element_type=jnp.float32) + b2_ref[...]
    # exact sigmoid (keeps outputs strictly inside [0, 1]).
    o_ref[...] = 1.0 / (1.0 + jnp.exp(-y))


def predicate_decoder_forward(params, x, *, block_b=256):
    """x: any tensor reshapeable to (B, U*P*2), e.g. the (B, U, P, 2) predicates."""
    B = x.shape[0]
    z = x.reshape(B, IN_F).astype(jnp.float32)

    # Fold eval-mode BatchNorm1d(1) into one scalar (scale, shift) pair -> SMEM.
    k = params["bn_g"][0] / jnp.sqrt(params["bn_v"][0] + EPS)
    sh = params["bn_b"][0] - params["bn_m"][0] * k
    bn = jnp.stack([k, sh]).reshape(1, 2).astype(jnp.float32)

    # bf16 weights (MXU-native); biases stay f32.  fc2 weight/bias padded on the
    # output axis to 128 lanes so the kernel's output store is unmasked.
    w1 = params["w1"].astype(jnp.bfloat16)                               # (162, 300)
    b1 = params["b1"].reshape(1, LAYER_SIZE).astype(jnp.float32)
    w2 = jnp.zeros((LAYER_SIZE, OUT_PAD), jnp.bfloat16).at[:, :OUT_F].set(
        params["w2"].astype(jnp.bfloat16))                               # (300, 128)
    b2 = jnp.zeros((1, OUT_PAD), jnp.float32).at[:, :OUT_F].set(
        params["b2"].astype(jnp.float32))

    # Batch tiling: TB rows per grid step (multiple of 8 sublanes), batch padded.
    TB = min(block_b, _round_up(B, 8))
    Bp = _round_up(B, TB)
    if Bp != B:
        z = jnp.pad(z, ((0, Bp - B), (0, 0)))

    out = pl.pallas_call(
        _decoder_kernel,
        out_shape=jax.ShapeDtypeStruct((Bp, OUT_PAD), jnp.float32),
        grid=(Bp // TB,),
        in_specs=[
            pl.BlockSpec((1, 2), lambda i: (0, 0),
                         memory_space=pltpu.MemorySpace.SMEM),      # folded BN scalars
            pl.BlockSpec((TB, IN_F), lambda i: (i, 0)),             # input tile
            pl.BlockSpec((IN_F, LAYER_SIZE), lambda i: (0, 0)),     # fc1 weight (bf16)
            pl.BlockSpec((1, LAYER_SIZE), lambda i: (0, 0)),        # fc1 bias (f32)
            pl.BlockSpec((LAYER_SIZE, OUT_PAD), lambda i: (0, 0)),  # fc2 weight (bf16, padded)
            pl.BlockSpec((1, OUT_PAD), lambda i: (0, 0)),           # fc2 bias (f32, padded)
        ],
        out_specs=pl.BlockSpec((TB, OUT_PAD), lambda i: (i, 0)),
        compiler_params=pltpu.CompilerParams(
            dimension_semantics=("parallel",)),
    )(bn, z, w1, b1, w2, b2)

    return out[:B, :OUT_F].reshape(B, N, N_OBJ_FEATURE)


# =====================================================================
# Deterministic synthetic parameters (PyTorch Linear weights stored (in, out)).
# =====================================================================
def init_params(key):
    ks = jax.random.split(key, 8)

    def nrm(k, shape, s=0.05):
        return (jax.random.normal(k, shape) * s).astype(jnp.float32)

    def uni(k, shape, lo=0.5, hi=1.5):
        return jax.random.uniform(k, shape, minval=lo, maxval=hi, dtype=jnp.float32)

    return {
        "w1": nrm(ks[0], (IN_F, LAYER_SIZE)),
        "b1": nrm(ks[1], (LAYER_SIZE,)),
        "bn_g": uni(ks[2], (1,)),
        "bn_b": nrm(ks[3], (1,), 0.1),
        "bn_m": nrm(ks[4], (1,), 0.1),
        "bn_v": uni(ks[5], (1,)),
        "w2": nrm(ks[6], (LAYER_SIZE, OUT_F)),
        "b2": nrm(ks[7], (OUT_F,)),
    }


if __name__ == "__main__":
    key = jax.random.PRNGKey(0)
    k_param, k_x = jax.random.split(key)

    params = init_params(k_param)
    B = 2
    # Decoder input = the (B, U, P, 2) predicate tensor produced upstream in FoSae.
    x = jax.nn.softmax(jax.random.normal(k_x, (B, U, P, 2), dtype=jnp.float32), axis=-1)

    fwd = jax.jit(functools.partial(predicate_decoder_forward, params))
    out = fwd(x)
    jax.block_until_ready(out)

    # Pure-JAX f32 reference for a sanity check.
    z = x.reshape(B, IN_F)
    k = params["bn_g"][0] / jnp.sqrt(params["bn_v"][0] + EPS)
    h = (z @ params["w1"] + params["b1"] - params["bn_m"][0]) * k + params["bn_b"][0]
    ref = jax.nn.sigmoid(h @ params["w2"] + params["b2"]).reshape(B, N, N_OBJ_FEATURE)

    assert out.shape == (B, N, N_OBJ_FEATURE)
    assert bool(jnp.all(jnp.isfinite(out)))
    assert bool(jnp.all((out >= 0.0) & (out <= 1.0)))
    assert bool(jnp.allclose(out, ref, atol=2e-2, rtol=2e-2))  # bf16 weights in kernel
    print("KERNEL_OK")
</pallas_src>

<mosaic_0001>
module attributes {stable_mosaic.version = 11 : i64} {
  func.func @_decoder_kernel(%arg0: i32, %arg1: memref<1x2xf32, #tpu.memory_space<smem>>, %arg2: memref<8x162xf32, #tpu.memory_space<vmem>>, %arg3: memref<162x300xbf16, #tpu.memory_space<vmem>>, %arg4: memref<1x300xf32, #tpu.memory_space<vmem>>, %arg5: memref<300x128xbf16, #tpu.memory_space<vmem>>, %arg6: memref<1x128xf32, #tpu.memory_space<vmem>>, %arg7: memref<8x128xf32, #tpu.memory_space<vmem>>) attributes {dimension_semantics = [#tpu.dimension_semantics<parallel>], iteration_bounds = array<i64: 1>, scalar_prefetch = 0 : i64, scratch_operands = 0 : i64, tpu.core_type = #tpu.core_type<tc>, window_params = [{transform_indices = @transform_0, window_bounds = array<i64: 1, 2>}, {transform_indices = @transform_1, window_bounds = array<i64: 8, 162>}, {pipeline_mode = #tpu.pipeline_mode<synchronous>, transform_indices = @transform_2, window_bounds = array<i64: 162, 300>}, {pipeline_mode = #tpu.pipeline_mode<synchronous>, transform_indices = @transform_3, window_bounds = array<i64: 1, 300>}, {pipeline_mode = #tpu.pipeline_mode<synchronous>, transform_indices = @transform_4, window_bounds = array<i64: 300, 128>}, {pipeline_mode = #tpu.pipeline_mode<synchronous>, transform_indices = @transform_5, window_bounds = array<i64: 1, 128>}, {transform_indices = @transform_6, window_bounds = array<i64: 8, 128>}]} {
    %c0 = arith.constant 0 : index
    %c0_0 = arith.constant 0 : index
    %0 = memref.load %arg1[%c0, %c0_0] : memref<1x2xf32, #tpu.memory_space<smem>>
    %c0_1 = arith.constant 0 : index
    %c1 = arith.constant 1 : index
    %1 = memref.load %arg1[%c0_1, %c1] : memref<1x2xf32, #tpu.memory_space<smem>>
    %c0_2 = arith.constant 0 : index
    %c0_3 = arith.constant 0 : index
    %2 = vector.load %arg2[%c0_2, %c0_3] : memref<8x162xf32, #tpu.memory_space<vmem>>, vector<8x162xf32>
    %3 = arith.truncf %2 : vector<8x162xf32> to vector<8x162xbf16>
    %c0_4 = arith.constant 0 : index
    %c0_5 = arith.constant 0 : index
    %4 = vector.load %arg3[%c0_4, %c0_5] : memref<162x300xbf16, #tpu.memory_space<vmem>>, vector<162x300xbf16>
    %cst = arith.constant dense<0.000000e+00> : vector<8x300xf32>
    %5 = tpu.matmul %3, %4, %cst {dimension_numbers = #tpu.dot_dimension_numbers<[1], [0], [0], [1], [0, 0, 1, 1], [], []>} : vector<8x162xbf16>, vector<162x300xbf16>, vector<8x300xf32> -> vector<8x300xf32>
    %c0_6 = arith.constant 0 : index
    %c0_7 = arith.constant 0 : index
    %6 = vector.load %arg4[%c0_6, %c0_7] : memref<1x300xf32, #tpu.memory_space<vmem>>, vector<1x300xf32>
    %7 = vector.broadcast %6 : vector<1x300xf32> to vector<8x300xf32>
    %8 = arith.addf %5, %7 : vector<8x300xf32>
    %9 = vector.broadcast %0 : f32 to vector<8x300xf32>
    %10 = arith.mulf %8, %9 : vector<8x300xf32>
    %11 = vector.broadcast %1 : f32 to vector<8x300xf32>
    %12 = arith.addf %10, %11 : vector<8x300xf32>
    %13 = arith.truncf %12 : vector<8x300xf32> to vector<8x300xbf16>
    %c0_8 = arith.constant 0 : index
    %c0_9 = arith.constant 0 : index
    %14 = vector.load %arg5[%c0_8, %c0_9] : memref<300x128xbf16, #tpu.memory_space<vmem>>, vector<300x128xbf16>
    %cst_10 = arith.constant dense<0.000000e+00> : vector<8x128xf32>
    %15 = tpu.matmul %13, %14, %cst_10 {dimension_numbers = #tpu.dot_dimension_numbers<[1], [0], [0], [1], [0, 0, 1, 1], [], []>} : vector<8x300xbf16>, vector<300x128xbf16>, vector<8x128xf32> -> vector<8x128xf32>
    %c0_11 = arith.constant 0 : index
    %c0_12 = arith.constant 0 : index
    %16 = vector.load %arg6[%c0_11, %c0_12] : memref<1x128xf32, #tpu.memory_space<vmem>>, vector<1x128xf32>
    %17 = vector.broadcast %16 : vector<1x128xf32> to vector<8x128xf32>
    %18 = arith.addf %15, %17 : vector<8x128xf32>
    %cst_13 = arith.constant 0.000000e+00 : f32
    %19 = vector.broadcast %cst_13 : f32 to vector<8x128xf32>
    %20 = arith.subf %19, %18 : vector<8x128xf32>
    %21 = math.exp %20 : vector<8x128xf32>
    %cst_14 = arith.constant 1.000000e+00 : f32
    %22 = vector.broadcast %cst_14 : f32 to vector<8x128xf32>
    %23 = arith.addf %22, %21 : vector<8x128xf32>
    %cst_15 = arith.constant 1.000000e+00 : f32
    %24 = vector.broadcast %cst_15 : f32 to vector<8x128xf32>
    %25 = arith.divf %24, %23 : vector<8x128xf32>
    %c0_16 = arith.constant 0 : index
    %c0_17 = arith.constant 0 : index
    %26 = vector.load %arg7[%c0_16, %c0_17] : memref<8x128xf32, #tpu.memory_space<vmem>>, vector<8x128xf32>
    tpu.vector_store %arg7[%c0_16, %c0_17], %25 {strides = array<i32>} : memref<8x128xf32, #tpu.memory_space<vmem>>, vector<8x128xf32>,
    return
  }
  func.func @transform_0(%arg0: i32) -> (i32, i32) {
    %c0_i32 = arith.constant 0 : i32
    %c0_i32_0 = arith.constant 0 : i32
    %c0_i32_1 = arith.constant 0 : i32
    return %c0_i32, %c0_i32_0 : i32, i32
  }
  func.func @transform_1(%arg0: i32) -> (i32, i32) {
    %c0_i32 = arith.constant 0 : i32
    %c0_i32_0 = arith.constant 0 : i32
    return %arg0, %c0_i32 : i32, i32
  }
  func.func @transform_2(%arg0: i32) -> (i32, i32) {
    %c0_i32 = arith.constant 0 : i32
    %c0_i32_0 = arith.constant 0 : i32
    %c0_i32_1 = arith.constant 0 : i32
    return %c0_i32, %c0_i32_0 : i32, i32
  }
  func.func @transform_3(%arg0: i32) -> (i32, i32) {
    %c0_i32 = arith.constant 0 : i32
    %c0_i32_0 = arith.constant 0 : i32
    %c0_i32_1 = arith.constant 0 : i32
    return %c0_i32, %c0_i32_0 : i32, i32
  }
  func.func @transform_4(%arg0: i32) -> (i32, i32) {
    %c0_i32 = arith.constant 0 : i32
    %c0_i32_0 = arith.constant 0 : i32
    %c0_i32_1 = arith.constant 0 : i32
    return %c0_i32, %c0_i32_0 : i32, i32
  }
  func.func @transform_5(%arg0: i32) -> (i32, i32) {
    %c0_i32 = arith.constant 0 : i32
    %c0_i32_0 = arith.constant 0 : i32
    %c0_i32_1 = arith.constant 0 : i32
    return %c0_i32, %c0_i32_0 : i32, i32
  }
  func.func @transform_6(%arg0: i32) -> (i32, i32) {
    %c0_i32 = arith.constant 0 : i32
    %c0_i32_0 = arith.constant 0 : i32
    return %arg0, %c0_i32 : i32, i32
  }
}

</mosaic_0001>

<bundles_post_ra>
// kernel: predicate_decoder_forward.1
= control target key start
LH: loop header
LB: loop body
LE: loop exit
PB: predicated region body
PF: predicated region fallthrough
CT: control target
= control target key end

     0   :  { %11 = vsyncpa [#allocation3], 0  ;;  %s1036_s0 = inlined_call_operand.vmem [shape: f32[1,2], index: 0, kind: input, shape index: {}]   ;;  %s1037_s1 = inlined_call_operand.vmem [shape: f32[8,162], index: 1, kind: input, shape index: {}]   ;;  %s1038_s2 = inlined_call_operand.vmem [shape: bf16[162,300], index: 2, kind: input, shape index: {}]   ;;  %s1039_s3 = inlined_call_operand.vmem [shape: f32[1,300], index: 3, kind: input, shape index: {}]   ;;  %s1040_s4 = inlined_call_operand.vmem [shape: bf16[300,128], index: 4, kind: input, shape index: {}]   ;;  %s1041_s5 = inlined_call_operand.vmem [shape: f32[1,128], index: 5, kind: input, shape index: {}]   ;;  %s1042_s6 = inlined_call_operand.vmem [shape: f32[8,128], index: 6, kind: output, shape index: {}]  }
   0x1   :  { %s18_s23 = sshll.u32 %s1036_s0, 4  ;;  %s19_s23 = int_to_ptr.vmem [resolvable:$true] %s18_s23 }
   0x2   :  { %s798_s24 = scalar_lea.vmem %s19_s23, 16  ;;  %p803_p1 = scmp.lt.s32.totalorder %s19_s23, %s19_s23 }
   0x3   :  { %p799_p0 = scmp.ne.s32.totalorder %s19_s23, %s798_s24  ;;  %p804_p2 = scmp.lt.s32.totalorder %s798_s24, %s798_s24 }
   0x5   :  { %p805_p3 = por %p804_p2, %p803_p1 }
   0x7   :  { %p806_p4 = pnand %p805_p3, %p799_p0 }
   0x9   :  { %809 = shalt.err (!%p806_p4)
}
   0xa   :  { %s812_s25 = smov [#allocation2]  }
   0xb   :  { %21 = dma.vmem_to_smem %s19_s23, 16, %s812_s25, [#allocation3]  }
   0xc   :  { %810 = dma.done.wait [#allocation3], 16  }
   0xd   :  { %811 = vsyncadd [#allocation3], 4294967280 }
   0xe   :  { %35 = sfence }
   0xf   :  { %v732_v0 = vld [vmem:[%s1038_s2 + $0x4] ss:$12 sps:$4 sm:$0xff]   ;;  %v734_v1 = vld [vmem:[%s1038_s2] ss:$12 sps:$4 sm:$0xff]   ;;  %v813_v2 = vmov 0   ;;  %vm270_vm0 = vcmask 277504   ;;  %v87_v62 = vlaneseq }
  0x10   :  { %325 = vmatprep.subr.bf16.mxu1 %v813_v2  ;;  %284 = vmatprep.subr.bf16.mxu0 %v732_v0  ;;  %v735_v3 = vld [vmem:[%s1038_s2 + $0x1c] ss:$12 sps:$4 sm:$0xff]   ;;  %v737_v4 = vld [vmem:[%s1038_s2 + $0x18] ss:$12 sps:$4 sm:$0xff]   ;;  %v739_v6 = vld [vmem:[%s1038_s2 + $0x34] ss:$12 sps:$4 sm:$0xff]  }
  0x11   :  { %285 = vmatpush1.bf16.msra.mxu0 %v734_v1  ;;  %v738_v5 = vld [vmem:[%s1038_s2 + $0x8] ss:$12 sps:$4 sm:$0xff]   ;;  %v742_v7 = vld [vmem:[%s1038_s2 + $0x20] ss:$12 sps:$4 sm:$0xff]   ;;  %v741_v8 = vld [vmem:[%s1038_s2 + $0x30] ss:$12 sps:$4 sm:$0xff]  }
  0x12   :  { %286 = vmatprep.subr.bf16.mxu0 %v735_v3  ;;  %326 = vmatpush1.bf16.msra.mxu1 %v738_v5  ;;  %v743_v9 = vld [vmem:[%s1038_s2 + $0x4c] ss:$12 sps:$4 sm:$0xff]   ;;  %v745_v11 = vld [vmem:[%s1038_s2 + $0x48] ss:$12 sps:$4 sm:$0xff]   ;;  %v747_v12 = vld [vmem:[%s1038_s2 + $0x64] ss:$12 sps:$4 sm:$0xff]  }
  0x13   :  { %327 = vmatprep.subr.bf16.mxu1 %v813_v2  ;;  %v746_v10 = vld [vmem:[%s1038_s2 + $0x38] ss:$12 sps:$4 sm:$0xff]   ;;  %v750_v13 = vld [vmem:[%s1038_s2 + $0x50] ss:$12 sps:$4 sm:$0xff]   ;;  %v749_v14 = vld [vmem:[%s1038_s2 + $0x60] ss:$12 sps:$4 sm:$0xff]  }
  0x14   :  { %v751_v15 = vld [vmem:[%s1038_s2 + $0x7c] ss:$12 sps:$4 sm:$0xff]   ;;  %v753_v17 = vld [vmem:[%s1038_s2 + $0x78] ss:$12 sps:$4 sm:$0xff]   ;;  %v755_v18 = vld [vmem:[%s1038_s2 + $0x94] ss:$12 sps:$4 sm:$0xff]  }
  0x15   :  { %287 = vmatpush1.bf16.msra.mxu0 %v737_v4  ;;  %v754_v16 = vld [vmem:[%s1038_s2 + $0x68] ss:$12 sps:$4 sm:$0xff]   ;;  %v758_v19 = vld [vmem:[%s1038_s2 + $0x80] ss:$12 sps:$4 sm:$0xff]   ;;  %v757_v20 = vld [vmem:[%s1038_s2 + $0x90] ss:$12 sps:$4 sm:$0xff]  }
  0x16   :  { %288 = vmatprep.subr.bf16.mxu0 %v739_v6  ;;  %328 = vmatpush1.bf16.msra.mxu1 %v742_v7  ;;  %v40_v21 = vld [vmem:[%s1037_s1 + $0x8] sm:$0xff]  ;;  %v762_v24 = vld [vmem:[%s1038_s2 + $0x98] ss:$12 sps:$4 sm:$0xff]   ;;  %v766_v27 = vld [vmem:[%s1038_s2 + $0xb0] ss:$12 sps:$4 sm:$0xff]   ;;  %vm274_vm1 = vcmask 1040384  }
  0x17   :  { %329 = vmatprep.subr.bf16.mxu1 %v813_v2  ;;  %v759_v22 = vld [vmem:[%s1038_s2 + $0xac] ss:$12 sps:$4 sm:$0xff]   ;;  %v42_v23 = vpack.c.bf16 %v40_v21, %v40_v21  ;;  %v761_v25 = vld [vmem:[%s1038_s2 + $0xa8] ss:$12 sps:$4 sm:$0xff]   ;;  %v763_v26 = vld [vmem:[%s1038_s2 + $0xc4] ss:$12 sps:$4 sm:$0xff]  }
  0x18   :  { %v83_v28 = vld [vmem:[%s1038_s2 + $0xf0] sm:$0x11]  ;;  %v765_v29 = vld [vmem:[%s1038_s2 + $0xc0] ss:$12 sps:$4 sm:$0xff]   ;;  %v767_v30 = vld [vmem:[%s1038_s2 + $0xdc] ss:$12 sps:$4 sm:$0xff]  }
  0x19   :  { %289 = vmatpush1.bf16.msra.mxu0 %v741_v8  ;;  %669 = vmatprep.mubr.msk.bf16.mxu0 %vm270_vm0, %v42_v23  ;;  %v665_v31 = vcombine.low %v83_v28, %v83_v28  ;;  %v770_v32 = vld [vmem:[%s1038_s2 + $0xc8] ss:$12 sps:$4 sm:$0xff]   ;;  %v769_v33 = vld [vmem:[%s1038_s2 + $0xd8] ss:$12 sps:$4 sm:$0xff]   ;;  %v773_v34 = vld [vmem:[%s1038_s2 + $0xe0] ss:$12 sps:$4 sm:$0xff]   ;;  %v666_v35 = vcombine.high %v83_v28, %v83_v28 }
  0x1a   :  { %290 = vmatprep.subr.bf16.mxu0 %v743_v9  ;;  %330 = vmatpush1.bf16.msra.mxu1 %v746_v10  ;;  %v774_v37 = vld [vmem:[%s1038_s2 + $0xf8] ss:$0 sps:$4 sm:$0x11]   ;;  %v39_v38 = vld [vmem:[%s1037_s1] sm:$0xff]  ;;  %v777_v43 = vld [vmem:[%s1040_s4 + $0x48] sm:$0xff]   ;;  %v814_v54 = vmov 0.0  }
  0x1b   :  { %331 = vmatprep.subr.bf16.mxu1 %v813_v2  ;;  %670 = vmatprep.mubr.msk.bf16.mxu1 %vm270_vm0, %v42_v23  ;;  %v276_v36 = vsel %vm274_vm1, %v665_v31, 0  ;;  %v775_v39 = vld [vmem:[%s1040_s4 + $0x40] sm:$0xff]   ;;  %v41_v40 = vpack.c.bf16 %v39_v38, %v39_v38  ;;  %v282_v41 = vsel %vm274_vm1, %v774_v37, 0  ;;  %v778_v44 = vld [vmem:[%s1040_s4 + $0x8] sm:$0xff]   ;;  %v779_v45 = vld [vmem:[%s1040_s4 + $0x50] sm:$0xff]   ;;  %vm538_vm2 = vcmask 1045504  }
  0x1c   :  { %v776_v42 = vld [vmem:[%s1040_s4] sm:$0xff]   ;;  %v780_v46 = vld [vmem:[%s1040_s4 + $0x10] sm:$0xff]   ;;  %v781_v47 = vld [vmem:[%s1040_s4 + $0x58] sm:$0xff]   ;;  %vm815_vm3 = vmmov 0   ;;  %v88_v63 = vshrl.u32 %v87_v62, 7  ;;  %s37_s28 = sld [smem:[#allocation2]] }
  0x1d   :  { %291 = vmatpush1.bf16.msra.mxu0 %v745_v11  ;;  %v782_v48 = vld [vmem:[%s1040_s4 + $0x18] sm:$0xff]   ;;  %v783_v49 = vld [vmem:[%s1040_s4 + $0x60] sm:$0xff]   ;;  %v785_v51 = vld [vmem:[%s1040_s4 + $0x68] sm:$0xff]   ;;  %s634_s29 = sld [smem:[#allocation2 + $0x1]]  ;;  %vm534_vm4 = vcmask 359424  }
  0x1e   :  { %292 = vmatprep.subr.bf16.mxu0 %v747_v12  ;;  %332 = vmatpush1.bf16.msra.mxu1 %v750_v13  ;;  %v784_v50 = vld [vmem:[%s1040_s4 + $0x20] sm:$0xff]   ;;  %v786_v52 = vld [vmem:[%s1040_s4 + $0x28] sm:$0xff]   ;;  %v788_v55 = vld [vmem:[%s1040_s4 + $0x70] sm:$0xff]   ;;  %v89_v0 = vsub.s32 0, %v88_v63  ;;  %v97_v3 = vsub.s32 2, %v88_v63 }
  0x1f   :  { %333 = vmatprep.subr.bf16.mxu1 %v813_v2  ;;  %v787_v53 = vld [vmem:[%s1040_s4 + $0x80] sm:$0xff]   ;;  %v789_v56 = vld [vmem:[%s1040_s4 + $0x30] sm:$0xff]   ;;  %v790_v57 = vld [vmem:[%s1040_s4 + $0x88] sm:$0xff]  }
  0x20   :  { %v791_v58 = vld [vmem:[%s1040_s4 + $0x78] sm:$0xff]   ;;  %v793_v60 = vld [vmem:[%s1040_s4 + $0x90] sm:$0x3f]   ;;  %v85_v1 = vld [vmem:[%s1039_s3] sm:$0x7] }
  0x21   :  { %293 = vmatpush1.bf16.msra.mxu0 %v749_v14  ;;  %v792_v59 = vld [vmem:[%s1040_s4 + $0x38] sm:$0xff]   ;;  %v540_v61 = vsel %vm538_vm2, %v793_v60, 0  ;;  %v90_v4 = vrot.slane %v85_v1, %v89_v0  ;;  %v98_v6 = vrot.slane %v85_v1, %v97_v3 }
  0x22   :  { %294 = vmatprep.subr.bf16.mxu0 %v751_v15  ;;  %334 = vmatpush1.bf16.msra.mxu1 %v754_v16  ;;  %v365_v8 = vstv %s37_s28 }
  0x23   :  { %335 = vmatprep.subr.bf16.mxu1 %v813_v2  ;;  %v369_v11 = vstv %s634_s29 }
  0x25   :  { %295 = vmatpush1.bf16.msra.mxu0 %v753_v17 }
  0x26   :  { %296 = vmatprep.subr.bf16.mxu0 %v755_v18  ;;  %336 = vmatpush1.bf16.msra.mxu1 %v758_v19 }
  0x27   :  { %337 = vmatprep.subr.bf16.mxu1 %v813_v2 }
  0x29   :  { %297 = vmatpush1.bf16.msra.mxu0 %v757_v20 }
  0x2a   :  { %298 = vmatprep.subr.bf16.mxu0 %v759_v22  ;;  %338 = vmatpush1.bf16.msra.mxu1 %v762_v24 }
  0x2b   :  { %339 = vmatprep.subr.bf16.mxu1 %v813_v2 }
  0x2d   :  { %299 = vmatpush1.bf16.msra.mxu0 %v761_v25 }
  0x2e   :  { %300 = vmatprep.subr.bf16.mxu0 %v763_v26  ;;  %340 = vmatpush1.bf16.msra.mxu1 %v766_v27 }
  0x2f   :  { %341 = vmatprep.subr.bf16.mxu1 %v813_v2 }
  0x31   :  { %301 = vmatpush1.bf16.msra.mxu0 %v765_v29 }
  0x32   :  { %302 = vmatprep.subr.bf16.mxu0 %v767_v30  ;;  %342 = vmatpush1.bf16.msra.mxu1 %v770_v32  ;;  %v671_v32 = vld [vmem:[%s1041_s5] ss:$0 sm:$0xff] }
  0x33   :  { %343 = vmatprep.subr.bf16.mxu1 %v813_v2 }
  0x35   :  { %303 = vmatpush1.bf16.msra.mxu0 %v769_v33 }
  0x36   :  { %668 = vmatprep.subr.msk.bf16.mxu0 %vm274_vm1, %v666_v35  ;;  %344 = vmatpush1.bf16.msra.mxu1 %v773_v34 }
  0x37   :  { %345 = vmatprep.subr.bf16.mxu1 %v813_v2  ;;  %v93_v2 = vsub.s32 1, %v88_v63 }
  0x39   :  { %305 = vmatpush1.bf16.msra.mxu0 %v276_v36  ;;  %v94_v5 = vrot.slane %v85_v1, %v93_v2 }
  0x3a   :  { %692 = vmatprep.subr.bf16.mxu0 %v775_v39  ;;  %346 = vmatpush1.bf16.msra.mxu1 %v282_v41 }
  0x3b   :  { %718 = vmatprep.subr.bf16.mxu1 %v814_v54 }
  0x3c   :  { %317 = vmatmul.mubr.bf16.vlgmr.msra.gmra.mrb[0].mxu0 %v41_v40 }
  0x3d   :  { %693 = vmatpush3.bf16.msra.mxu0 %v776_v42  ;;  %358 = vmatmul.mubr.bf16.vlgmr.msra.gmra.mrb[0].mxu1 %v41_v40 }
  0x3e   :  { %694 = vmatprep.subr.bf16.mxu0 %v777_v43  ;;  %719 = vmatpush3.bf16.msra.mxu1 %v787_v53 }
  0x3f   :  { %720 = vmatprep.subr.bf16.mxu1 %v814_v54  ;;  %724 = vmatprep.mubr.msk.bf16.mxu1 %vm815_vm3, %v814_v54 }
  0x41   :  { %695 = vmatpush3.bf16.msra.mxu0 %v778_v44 }
  0x42   :  { %696 = vmatprep.subr.bf16.mxu0 %v779_v45  ;;  %721 = vmatpush3.bf16.msra.mxu1 %v790_v57 }
  0x43   :  { %722 = vmatprep.subr.bf16.mxu1 %v814_v54 }
  0x45   :  { %697 = vmatpush3.bf16.msra.mxu0 %v780_v46 }
  0x46   :  { %698 = vmatprep.subr.bf16.mxu0 %v781_v47  ;;  %723 = vmatpush3.bf16.msra.mxu1 %v540_v61 }
  0x49   :  { %699 = vmatpush3.bf16.msra.mxu0 %v782_v48 }
  0x4a   :  { %700 = vmatprep.subr.bf16.mxu0 %v783_v49 }
  0x4d   :  { %701 = vmatpush3.bf16.msra.mxu0 %v784_v50 }
  0x4e   :  { %702 = vmatprep.subr.bf16.mxu0 %v785_v51 }
  0x51   :  { %703 = vmatpush3.bf16.msra.mxu0 %v786_v52 }
  0x52   :  { %704 = vmatprep.subr.bf16.mxu0 %v788_v55 }
  0x55   :  { %705 = vmatpush3.bf16.msra.mxu0 %v789_v56 }
  0x56   :  { %706 = vmatprep.subr.bf16.mxu0 %v791_v58 }
  0x59   :  { %707 = vmatpush3.bf16.msra.mxu0 %v792_v59 }
 0x10f   :  { %v318_v7 = vpop.f32.mrb[0].mxu0 }
 0x110   :  { %v319_v9 = vadd.f32 %v318_v7, %v90_v4  ;;  %v320_v10 = vpop.f32.mrb[1].mxu0  ;;  %v359_v14 = vpop.f32.mrb[0].mxu1 }
 0x111   :  { %v321_v12 = vadd.f32 %v320_v10, %v94_v5  ;;  %v322_v13 = vpop.f32.mrb[2].mxu0  ;;  %v360_v17 = vadd.f32 %v359_v14, %v98_v6  ;;  %v361_v18 = vpop.f32.mrb[1].mxu1 }
 0x112   :  { %v366_v15 = vmul.f32 %v365_v8, %v319_v9  ;;  %v323_v16 = vpop.f32.mrb[3].mxu0  ;;  %v362_v20 = vpop.f32.mrb[2].mxu1 }
 0x113   :  { %v367_v19 = vmul.f32 %v365_v8, %v321_v12  ;;  %v368_v22 = vmul.f32 %v365_v8, %v360_v17  ;;  %v363_v23 = vpop.f32.mrb[3].mxu1 }
 0x114   :  { %v370_v21 = vadd.f32 %v369_v11, %v366_v15 }
 0x115   :  { %v371_v24 = vadd.f32 %v369_v11, %v367_v19  ;;  %v372_v25 = vadd.f32 %v369_v11, %v368_v22 }
 0x116   :  { %v373_v27 = vpack.c.bf16 %v370_v21, %v370_v21 }
 0x117   :  { %v374_v26 = vpack.c.bf16 %v371_v24, %v371_v24  ;;  %v375_v28 = vpack.c.bf16 %v372_v25, %v372_v25 }
 0x119   :  { %574 = vmatprep.mubr.bf16.mxu0 %v374_v26  ;;  %725 = vmatmul.mubr.msk.bf16.vlgmr.msra.gmra.mrb[4].mxu1 %vm534_vm4, %v375_v28 }
 0x11a   :  { %575 = vmatmul.mubr.bf16.vlgmr.msra.gmra.mrb[4].mxu0 %v373_v27 }
 0x1ec   :  { %v616_v30 = vpop.f32.mrb[4].mxu1 }
 0x1ed   :  { %v708_v29 = vpop.f32.mrb[4].mxu0  ;;  %v726_v33 = vpop.f32.mrb[5].mxu1 }
 0x1ee   :  { %v709_v31 = vpop.f32.mrb[5].mxu0  ;;  %v619_v36 = vpop.f32.mrb[6].mxu1 }
 0x1ef   :  { %v710_v34 = vadd.f32 %v709_v31, %v708_v29  ;;  %v711_v35 = vpop.f32.mrb[6].mxu0  ;;  %v727_v38 = vpop.f32.mrb[7].mxu1 }
 0x1f0   :  { %v712_v37 = vpop.f32.mrb[7].mxu0 }
 0x1f1   :  { %v577_v39 = vadd.f32 %v710_v34, %v671_v32 }
 0x1f3   :  { %v617_v40 = vadd.f32 %v616_v30, %v577_v39 }
 0x1f5   :  { %v622_v41 = vsub.f32 0.0, %v617_v40 }
 0x1f7   :  { %v623_v42 = vmul.f32 1.442695, %v622_v41 }
 0x1f9   :  { %794 = vpow2.f32 %v623_v42 }
 0x203   :  { %v795_v43 = vpop.eup %794 }
 0x204   :  { %v625_v44 = vadd.f32 1.0, %v795_v43 }
 0x206   :  { %796 = vrcp.f32 %v625_v44 }
 0x210   :  { %v797_v45 = vpop.eup %796 }
 0x211   :  { %628 = vst [vmem:[%s1042_s6] sm:$0xff] %v797_v45 }
 0x212   :  { %633 = vsyncpa [#allocation3], 1 }

</bundles_post_ra>
